<compile_context>
chip_gen: v7x
topology: tpu7x:2x2x1
jax: 0.10.0
libtpu: 0.0.40
codegen_flags: <defaults>
</compile_context>

<pallas_src>
import functools

import numpy as np

import jax
import jax.numpy as jnp
from jax.experimental import pallas as pl
from jax.experimental.pallas import tpu as pltpu

NEG_SLOPE = 1.0   # matches nn.LeakyReLU(True) -> negative_slope = True = 1.0
BN_EPS = 1e-5


def _residual_kernel(x_ref, w_ref, b_ref, m_ref, o_ref, patches_ref,
                     *, Bt, C, H, W, neg_slope, n_slots):
    """Processes `Bt` images per grid step, NCHW-native (lanes = H*W).

    x_ref       : (Bt, C, H*W)          input block (conv source AND residual)
    w_ref       : (C, 9*C)              conv weights, BN scale folded in,
                                        columns ordered (kh, kw, cin)
    b_ref       : (C, 1)                folded BN bias = beta - mean * scale
    m_ref       : (9, H*W)              per-tap 0/1 halo masks (precomputed)
    o_ref       : (Bt, C, H*W)
    patches_ref : (n_slots, 9*C, H*W)   VMEM scratch: im2col patch matrix,
                                        double-buffered so image bt+1's patch
                                        build overlaps image bt's MXU matmul.
    """
    HW = H * W
    wcat = w_ref[...]                 # (C, 9C)
    bias = b_ref[...]                 # (C, 1) -> broadcasts over lanes

    for bt in range(Bt):
        slot = bt % n_slots           # static (Python int)
        x = x_ref[bt]                 # (C, HW)

        # Build the im2col patch matrix.  Tap (dy, dx) of a same-padded 3x3
        # conv is x shifted by the flattened offset dy*W + dx; the shift is a
        # lane roll (XLU) and out-of-image positions (image borders + the
        # wrap-around of the roll) are zeroed by the precomputed mask.
        t = 0
        for dy in (-1, 0, 1):
            for dx in (-1, 0, 1):
                s = dy * W + dx
                if s == 0:
                    tap = x
                else:
                    tap = pltpu.roll(x, shift=(-s) % HW, axis=1)
                    tap = tap * m_ref[t:t + 1, :]
                patches_ref[slot, t * C:(t + 1) * C, :] = tap
                t += 1

        # Single fused MXU matmul over all 9 taps (K = 9*C).
        y = jnp.dot(wcat, patches_ref[slot],
                    preferred_element_type=jnp.float32)   # (C, HW)
        y = y + bias                                      # folded BN bias
        if neg_slope != 1.0:                              # slope 1.0 == identity
            y = jnp.where(y >= 0, y, neg_slope * y)
        o_ref[bt] = (x + y).astype(o_ref.dtype)           # residual add


def _pick_tiling(B, Cp, HW):
    """Choose (bt, n_slots, vmem_limit_bytes) from an explicit VMEM budget."""
    img = Cp * HW * 4                                  # one f32 image block
    w_bytes = 2 * 9 * Cp * Cp * 4                      # weights, double-buffered
    const_bytes = 2 * (Cp * 128 + 16 * HW) * 4         # bias + masks (tile-padded)
    budget = 40 << 20

    # Double-buffer the im2col scratch when it fits; else fall back to one.
    n_slots = 2 if (2 * 9 * Cp * HW * 4 + 4 * img + w_bytes + const_bytes
                    + (2 << 20)) <= budget else 1
    scratch = n_slots * 9 * Cp * HW * 4

    by_vmem = max((budget - scratch - w_bytes - const_bytes) // (4 * img), 1)
    by_block = max((2 << 20) // img, 1)                # ~2 MiB input block target
    bt = int(max(1, min(B, by_vmem, by_block, 16)))    # 16 bounds in-kernel unroll
    if B >= 4:
        bt = min(bt, B // 2)                           # >=2 grid steps (2-TC parts)
    while B % bt:
        bt -= 1

    need = 4 * bt * img + w_bytes + const_bytes + scratch
    vmem_limit = int(min(max(need + (4 << 20), 32 << 20), 64 << 20))
    return bt, n_slots, vmem_limit


def residual_layer(x_nchw, w_oihw, gamma, beta, running_mean, running_var):
    """x_nchw: (B, C, H, W) float32; w_oihw: (C, C, 3, 3) float32."""
    B, C, H, W = x_nchw.shape
    HW = H * W
    Cp = -(-C // 8) * 8                                # pad channels to sublanes

    # Fold eval-mode BatchNorm: scale goes into the weights, bias stays.
    scale = gamma / jnp.sqrt(running_var + BN_EPS)                   # (C,)
    bias = (beta - running_mean * scale).astype(jnp.float32)         # (C,)

    # NCHW stays NCHW; just flatten spatial so H*W sits on the lane axis.
    x = x_nchw.astype(jnp.float32).reshape(B, C, HW)
    w = w_oihw.astype(jnp.float32) * scale[:, None, None, None]      # (C,C,3,3)

    if Cp != C:
        x = jnp.pad(x, ((0, 0), (0, Cp - C), (0, 0)))
        w = jnp.pad(w, ((0, Cp - C), (0, Cp - C), (0, 0), (0, 0)))
        bias = jnp.pad(bias, (0, Cp - C))

    # (Cout, Cin, kh, kw) -> (Cout, kh, kw, Cin) -> (Cout, 9*Cin).
    wcat = jnp.transpose(w, (0, 2, 3, 1)).reshape(Cp, 9 * Cp)
    bias_col = bias.reshape(Cp, 1)

    # Precomputed 0/1 halo masks for the 9 taps (tiny, static).
    hh = np.arange(HW, dtype=np.int64) // W
    ww = np.arange(HW, dtype=np.int64) % W
    masks_np = np.ones((9, HW), dtype=np.float32)
    t = 0
    for dy in (-1, 0, 1):
        for dx in (-1, 0, 1):
            valid = ((hh + dy >= 0) & (hh + dy < H) &
                     (ww + dx >= 0) & (ww + dx < W))
            masks_np[t] = valid.astype(np.float32)
            t += 1
    masks = jnp.asarray(masks_np)

    bt, n_slots, vmem_limit = _pick_tiling(B, Cp, HW)

    kernel = functools.partial(_residual_kernel, Bt=bt, C=Cp, H=H, W=W,
                               neg_slope=NEG_SLOPE, n_slots=n_slots)

    out = pl.pallas_call(
        kernel,
        out_shape=jax.ShapeDtypeStruct((B, Cp, HW), jnp.float32),
        grid_spec=pltpu.PrefetchScalarGridSpec(
            num_scalar_prefetch=0,
            grid=(B // bt,),
            in_specs=[
                pl.BlockSpec((bt, Cp, HW), lambda i: (i, 0, 0)),   # x
                pl.BlockSpec((Cp, 9 * Cp), lambda i: (0, 0)),      # fused weights
                pl.BlockSpec((Cp, 1), lambda i: (0, 0)),           # folded bias
                pl.BlockSpec((9, HW), lambda i: (0, 0)),           # halo masks
            ],
            out_specs=pl.BlockSpec((bt, Cp, HW), lambda i: (i, 0, 0)),
            scratch_shapes=[pltpu.VMEM((n_slots, 9 * Cp, HW), jnp.float32)],
        ),
        compiler_params=pltpu.CompilerParams(
            dimension_semantics=("parallel",),
            vmem_limit_bytes=vmem_limit),
    )(x, wcat, bias_col, masks)

    return out[:, :C, :].reshape(B, C, H, W)


def _reference(x_nchw, w_oihw, gamma, beta, running_mean, running_var):
    """Plain-JAX reference (same math) for a correctness check."""
    conv = jax.lax.conv_general_dilated(
        x_nchw, w_oihw, window_strides=(1, 1), padding=((1, 1), (1, 1)),
        dimension_numbers=("NCHW", "OIHW", "NCHW"))
    scale = (gamma / jnp.sqrt(running_var + BN_EPS))[None, :, None, None]
    bias = (beta - running_mean * gamma /
            jnp.sqrt(running_var + BN_EPS))[None, :, None, None]
    y = conv * scale + bias
    y = jnp.where(y >= 0, y, NEG_SLOPE * y)
    return x_nchw + y


if __name__ == "__main__":
    key = jax.random.PRNGKey(0)
    k_x, k_w, k_g, k_b, k_m, k_v = jax.random.split(key, 6)

    B, C, H, W = 2, 4, 16, 16
    x = jax.random.normal(k_x, (B, C, H, W), jnp.float32)
    w = jax.random.normal(k_w, (C, C, 3, 3), jnp.float32) * 0.1
    gamma = 1.0 + 0.1 * jax.random.normal(k_g, (C,), jnp.float32)
    beta = 0.1 * jax.random.normal(k_b, (C,), jnp.float32)
    running_mean = 0.1 * jax.random.normal(k_m, (C,), jnp.float32)
    running_var = jnp.abs(1.0 + 0.1 * jax.random.normal(k_v, (C,), jnp.float32))

    out = residual_layer(x, w, gamma, beta, running_mean, running_var)
    out = jax.block_until_ready(out)

    ref = _reference(x, w, gamma, beta, running_mean, running_var)
    assert out.shape == (B, C, H, W)
    assert jnp.allclose(out, ref, atol=1e-4, rtol=1e-4), "mismatch vs reference"

    print("KERNEL_OK")
</pallas_src>

<mosaic_0001>
module attributes {stable_mosaic.version = 11 : i64} {
  func.func @_residual_kernel(%arg0: i32, %arg1: memref<2x8x256xf32, #tpu.memory_space<vmem>>, %arg2: memref<8x72xf32, #tpu.memory_space<vmem>>, %arg3: memref<8x1xf32, #tpu.memory_space<vmem>>, %arg4: memref<9x256xf32, #tpu.memory_space<vmem>>, %arg5: memref<2x8x256xf32, #tpu.memory_space<vmem>>, %arg6: memref<2x72x256xf32, #tpu.memory_space<vmem>>) attributes {dimension_semantics = [#tpu.dimension_semantics<parallel>], iteration_bounds = array<i64: 1>, scalar_prefetch = 0 : i64, scratch_operands = 1 : i64, tpu.core_type = #tpu.core_type<tc>, window_params = [{transform_indices = @transform_0, window_bounds = array<i64: 2, 8, 256>}, {pipeline_mode = #tpu.pipeline_mode<synchronous>, transform_indices = @transform_1, window_bounds = array<i64: 8, 72>}, {pipeline_mode = #tpu.pipeline_mode<synchronous>, transform_indices = @transform_2, window_bounds = array<i64: 8, 1>}, {pipeline_mode = #tpu.pipeline_mode<synchronous>, transform_indices = @transform_3, window_bounds = array<i64: 9, 256>}, {transform_indices = @transform_4, window_bounds = array<i64: 2, 8, 256>}]} {
    %c0 = arith.constant 0 : index
    %c0_0 = arith.constant 0 : index
    %0 = vector.load %arg2[%c0, %c0_0] : memref<8x72xf32, #tpu.memory_space<vmem>>, vector<8x72xf32>
    %c0_1 = arith.constant 0 : index
    %c0_2 = arith.constant 0 : index
    %1 = vector.load %arg3[%c0_1, %c0_2] : memref<8x1xf32, #tpu.memory_space<vmem>>, vector<8x1xf32>
    %c0_3 = arith.constant 0 : index
    %c0_4 = arith.constant 0 : index
    %c0_5 = arith.constant 0 : index
    %2 = vector.load %arg1[%c0_3, %c0_4, %c0_5] : memref<2x8x256xf32, #tpu.memory_space<vmem>>, vector<1x8x256xf32>
    %3 = vector.shape_cast %2 : vector<1x8x256xf32> to vector<8x256xf32>
    %c17_i32 = arith.constant 17 : i32
    %4 = tpu.dynamic_rotate %3 by %c17_i32 dim 1 : vector<8x256xf32>, i32 -> vector<8x256xf32>
    %c0_6 = arith.constant 0 : index
    %c0_7 = arith.constant 0 : index
    %5 = vector.load %arg4[%c0_6, %c0_7] : memref<9x256xf32, #tpu.memory_space<vmem>>, vector<1x256xf32>
    %6 = vector.broadcast %5 : vector<1x256xf32> to vector<8x256xf32>
    %7 = arith.mulf %4, %6 : vector<8x256xf32>
    %c0_8 = arith.constant 0 : index
    %c0_9 = arith.constant 0 : index
    %c0_10 = arith.constant 0 : index
    %8 = vector.load %arg6[%c0_8, %c0_9, %c0_10] : memref<2x72x256xf32, #tpu.memory_space<vmem>>, vector<1x8x256xf32>
    %9 = vector.shape_cast %8 : vector<1x8x256xf32> to vector<8x256xf32>
    %10 = vector.shape_cast %7 : vector<8x256xf32> to vector<1x8x256xf32>
    tpu.vector_store %arg6[%c0_8, %c0_9, %c0_10], %10 {strides = array<i32>} : memref<2x72x256xf32, #tpu.memory_space<vmem>>, vector<1x8x256xf32>,
    %c16_i32 = arith.constant 16 : i32
    %11 = tpu.dynamic_rotate %3 by %c16_i32 dim 1 : vector<8x256xf32>, i32 -> vector<8x256xf32>
    %c1 = arith.constant 1 : index
    %c0_11 = arith.constant 0 : index
    %12 = vector.load %arg4[%c1, %c0_11] : memref<9x256xf32, #tpu.memory_space<vmem>>, vector<1x256xf32>
    %13 = vector.broadcast %12 : vector<1x256xf32> to vector<8x256xf32>
    %14 = arith.mulf %11, %13 : vector<8x256xf32>
    %c0_12 = arith.constant 0 : index
    %c8 = arith.constant 8 : index
    %c0_13 = arith.constant 0 : index
    %15 = vector.load %arg6[%c0_12, %c8, %c0_13] : memref<2x72x256xf32, #tpu.memory_space<vmem>>, vector<1x8x256xf32>
    %16 = vector.shape_cast %15 : vector<1x8x256xf32> to vector<8x256xf32>
    %17 = vector.shape_cast %14 : vector<8x256xf32> to vector<1x8x256xf32>
    tpu.vector_store %arg6[%c0_12, %c8, %c0_13], %17 {strides = array<i32>} : memref<2x72x256xf32, #tpu.memory_space<vmem>>, vector<1x8x256xf32>,
    %c15_i32 = arith.constant 15 : i32
    %18 = tpu.dynamic_rotate %3 by %c15_i32 dim 1 : vector<8x256xf32>, i32 -> vector<8x256xf32>
    %c2 = arith.constant 2 : index
    %c0_14 = arith.constant 0 : index
    %19 = vector.load %arg4[%c2, %c0_14] : memref<9x256xf32, #tpu.memory_space<vmem>>, vector<1x256xf32>
    %20 = vector.broadcast %19 : vector<1x256xf32> to vector<8x256xf32>
    %21 = arith.mulf %18, %20 : vector<8x256xf32>
    %c0_15 = arith.constant 0 : index
    %c16 = arith.constant 16 : index
    %c0_16 = arith.constant 0 : index
    %22 = vector.load %arg6[%c0_15, %c16, %c0_16] : memref<2x72x256xf32, #tpu.memory_space<vmem>>, vector<1x8x256xf32>
    %23 = vector.shape_cast %22 : vector<1x8x256xf32> to vector<8x256xf32>
    %24 = vector.shape_cast %21 : vector<8x256xf32> to vector<1x8x256xf32>
    tpu.vector_store %arg6[%c0_15, %c16, %c0_16], %24 {strides = array<i32>} : memref<2x72x256xf32, #tpu.memory_space<vmem>>, vector<1x8x256xf32>,
    %c1_i32 = arith.constant 1 : i32
    %25 = tpu.dynamic_rotate %3 by %c1_i32 dim 1 : vector<8x256xf32>, i32 -> vector<8x256xf32>
    %c3 = arith.constant 3 : index
    %c0_17 = arith.constant 0 : index
    %26 = vector.load %arg4[%c3, %c0_17] : memref<9x256xf32, #tpu.memory_space<vmem>>, vector<1x256xf32>
    %27 = vector.broadcast %26 : vector<1x256xf32> to vector<8x256xf32>
    %28 = arith.mulf %25, %27 : vector<8x256xf32>
    %c0_18 = arith.constant 0 : index
    %c24 = arith.constant 24 : index
    %c0_19 = arith.constant 0 : index
    %29 = vector.load %arg6[%c0_18, %c24, %c0_19] : memref<2x72x256xf32, #tpu.memory_space<vmem>>, vector<1x8x256xf32>
    %30 = vector.shape_cast %29 : vector<1x8x256xf32> to vector<8x256xf32>
    %31 = vector.shape_cast %28 : vector<8x256xf32> to vector<1x8x256xf32>
    tpu.vector_store %arg6[%c0_18, %c24, %c0_19], %31 {strides = array<i32>} : memref<2x72x256xf32, #tpu.memory_space<vmem>>, vector<1x8x256xf32>,
    %c0_20 = arith.constant 0 : index
    %c32 = arith.constant 32 : index
    %c0_21 = arith.constant 0 : index
    %32 = vector.load %arg6[%c0_20, %c32, %c0_21] : memref<2x72x256xf32, #tpu.memory_space<vmem>>, vector<1x8x256xf32>
    %33 = vector.shape_cast %32 : vector<1x8x256xf32> to vector<8x256xf32>
    %34 = vector.shape_cast %3 : vector<8x256xf32> to vector<1x8x256xf32>
    tpu.vector_store %arg6[%c0_20, %c32, %c0_21], %34 {strides = array<i32>} : memref<2x72x256xf32, #tpu.memory_space<vmem>>, vector<1x8x256xf32>,
    %c255_i32 = arith.constant 255 : i32
    %35 = tpu.dynamic_rotate %3 by %c255_i32 dim 1 : vector<8x256xf32>, i32 -> vector<8x256xf32>
    %c5 = arith.constant 5 : index
    %c0_22 = arith.constant 0 : index
    %36 = vector.load %arg4[%c5, %c0_22] : memref<9x256xf32, #tpu.memory_space<vmem>>, vector<1x256xf32>
    %37 = vector.broadcast %36 : vector<1x256xf32> to vector<8x256xf32>
    %38 = arith.mulf %35, %37 : vector<8x256xf32>
    %c0_23 = arith.constant 0 : index
    %c40 = arith.constant 40 : index
    %c0_24 = arith.constant 0 : index
    %39 = vector.load %arg6[%c0_23, %c40, %c0_24] : memref<2x72x256xf32, #tpu.memory_space<vmem>>, vector<1x8x256xf32>
    %40 = vector.shape_cast %39 : vector<1x8x256xf32> to vector<8x256xf32>
    %41 = vector.shape_cast %38 : vector<8x256xf32> to vector<1x8x256xf32>
    tpu.vector_store %arg6[%c0_23, %c40, %c0_24], %41 {strides = array<i32>} : memref<2x72x256xf32, #tpu.memory_space<vmem>>, vector<1x8x256xf32>,
    %c241_i32 = arith.constant 241 : i32
    %42 = tpu.dynamic_rotate %3 by %c241_i32 dim 1 : vector<8x256xf32>, i32 -> vector<8x256xf32>
    %c6 = arith.constant 6 : index
    %c0_25 = arith.constant 0 : index
    %43 = vector.load %arg4[%c6, %c0_25] : memref<9x256xf32, #tpu.memory_space<vmem>>, vector<1x256xf32>
    %44 = vector.broadcast %43 : vector<1x256xf32> to vector<8x256xf32>
    %45 = arith.mulf %42, %44 : vector<8x256xf32>
    %c0_26 = arith.constant 0 : index
    %c48 = arith.constant 48 : index
    %c0_27 = arith.constant 0 : index
    %46 = vector.load %arg6[%c0_26, %c48, %c0_27] : memref<2x72x256xf32, #tpu.memory_space<vmem>>, vector<1x8x256xf32>
    %47 = vector.shape_cast %46 : vector<1x8x256xf32> to vector<8x256xf32>
    %48 = vector.shape_cast %45 : vector<8x256xf32> to vector<1x8x256xf32>
    tpu.vector_store %arg6[%c0_26, %c48, %c0_27], %48 {strides = array<i32>} : memref<2x72x256xf32, #tpu.memory_space<vmem>>, vector<1x8x256xf32>,
    %c240_i32 = arith.constant 240 : i32
    %49 = tpu.dynamic_rotate %3 by %c240_i32 dim 1 : vector<8x256xf32>, i32 -> vector<8x256xf32>
    %c7 = arith.constant 7 : index
    %c0_28 = arith.constant 0 : index
    %50 = vector.load %arg4[%c7, %c0_28] : memref<9x256xf32, #tpu.memory_space<vmem>>, vector<1x256xf32>
    %51 = vector.broadcast %50 : vector<1x256xf32> to vector<8x256xf32>
    %52 = arith.mulf %49, %51 : vector<8x256xf32>
    %c0_29 = arith.constant 0 : index
    %c56 = arith.constant 56 : index
    %c0_30 = arith.constant 0 : index
    %53 = vector.load %arg6[%c0_29, %c56, %c0_30] : memref<2x72x256xf32, #tpu.memory_space<vmem>>, vector<1x8x256xf32>
    %54 = vector.shape_cast %53 : vector<1x8x256xf32> to vector<8x256xf32>
    %55 = vector.shape_cast %52 : vector<8x256xf32> to vector<1x8x256xf32>
    tpu.vector_store %arg6[%c0_29, %c56, %c0_30], %55 {strides = array<i32>} : memref<2x72x256xf32, #tpu.memory_space<vmem>>, vector<1x8x256xf32>,
    %c239_i32 = arith.constant 239 : i32
    %56 = tpu.dynamic_rotate %3 by %c239_i32 dim 1 : vector<8x256xf32>, i32 -> vector<8x256xf32>
    %c8_31 = arith.constant 8 : index
    %c0_32 = arith.constant 0 : index
    %57 = vector.load %arg4[%c8_31, %c0_32] : memref<9x256xf32, #tpu.memory_space<vmem>>, vector<1x256xf32>
    %58 = vector.broadcast %57 : vector<1x256xf32> to vector<8x256xf32>
    %59 = arith.mulf %56, %58 : vector<8x256xf32>
    %c0_33 = arith.constant 0 : index
    %c64 = arith.constant 64 : index
    %c0_34 = arith.constant 0 : index
    %60 = vector.load %arg6[%c0_33, %c64, %c0_34] : memref<2x72x256xf32, #tpu.memory_space<vmem>>, vector<1x8x256xf32>
    %61 = vector.shape_cast %60 : vector<1x8x256xf32> to vector<8x256xf32>
    %62 = vector.shape_cast %59 : vector<8x256xf32> to vector<1x8x256xf32>
    tpu.vector_store %arg6[%c0_33, %c64, %c0_34], %62 {strides = array<i32>} : memref<2x72x256xf32, #tpu.memory_space<vmem>>, vector<1x8x256xf32>,
    %c0_35 = arith.constant 0 : index
    %c0_36 = arith.constant 0 : index
    %c0_37 = arith.constant 0 : index
    %63 = vector.load %arg6[%c0_35, %c0_36, %c0_37] : memref<2x72x256xf32, #tpu.memory_space<vmem>>, vector<1x72x256xf32>
    %64 = vector.shape_cast %63 : vector<1x72x256xf32> to vector<72x256xf32>
    %cst = arith.constant dense<0.000000e+00> : vector<8x256xf32>
    %65 = tpu.matmul %0, %64, %cst {dimension_numbers = #tpu.dot_dimension_numbers<[1], [0], [0], [1], [0, 0, 1, 1], [], []>} : vector<8x72xf32>, vector<72x256xf32>, vector<8x256xf32> -> vector<8x256xf32>
    %66 = vector.broadcast %1 : vector<8x1xf32> to vector<8x256xf32>
    %67 = arith.addf %65, %66 : vector<8x256xf32>
    %68 = arith.addf %3, %67 : vector<8x256xf32>
    %c0_38 = arith.constant 0 : index
    %c0_39 = arith.constant 0 : index
    %c0_40 = arith.constant 0 : index
    %69 = vector.load %arg5[%c0_38, %c0_39, %c0_40] : memref<2x8x256xf32, #tpu.memory_space<vmem>>, vector<1x8x256xf32>
    %70 = vector.shape_cast %69 : vector<1x8x256xf32> to vector<8x256xf32>
    %71 = vector.shape_cast %68 : vector<8x256xf32> to vector<1x8x256xf32>
    tpu.vector_store %arg5[%c0_38, %c0_39, %c0_40], %71 {strides = array<i32>} : memref<2x8x256xf32, #tpu.memory_space<vmem>>, vector<1x8x256xf32>,
    %c1_41 = arith.constant 1 : index
    %c0_42 = arith.constant 0 : index
    %c0_43 = arith.constant 0 : index
    %72 = vector.load %arg1[%c1_41, %c0_42, %c0_43] : memref<2x8x256xf32, #tpu.memory_space<vmem>>, vector<1x8x256xf32>
    %73 = vector.shape_cast %72 : vector<1x8x256xf32> to vector<8x256xf32>
    %c17_i32_44 = arith.constant 17 : i32
    %74 = tpu.dynamic_rotate %73 by %c17_i32_44 dim 1 : vector<8x256xf32>, i32 -> vector<8x256xf32>
    %c0_45 = arith.constant 0 : index
    %c0_46 = arith.constant 0 : index
    %75 = vector.load %arg4[%c0_45, %c0_46] : memref<9x256xf32, #tpu.memory_space<vmem>>, vector<1x256xf32>
    %76 = vector.broadcast %75 : vector<1x256xf32> to vector<8x256xf32>
    %77 = arith.mulf %74, %76 : vector<8x256xf32>
    %c1_47 = arith.constant 1 : index
    %c0_48 = arith.constant 0 : index
    %c0_49 = arith.constant 0 : index
    %78 = vector.load %arg6[%c1_47, %c0_48, %c0_49] : memref<2x72x256xf32, #tpu.memory_space<vmem>>, vector<1x8x256xf32>
    %79 = vector.shape_cast %78 : vector<1x8x256xf32> to vector<8x256xf32>
    %80 = vector.shape_cast %77 : vector<8x256xf32> to vector<1x8x256xf32>
    tpu.vector_store %arg6[%c1_47, %c0_48, %c0_49], %80 {strides = array<i32>} : memref<2x72x256xf32, #tpu.memory_space<vmem>>, vector<1x8x256xf32>,
    %c16_i32_50 = arith.constant 16 : i32
    %81 = tpu.dynamic_rotate %73 by %c16_i32_50 dim 1 : vector<8x256xf32>, i32 -> vector<8x256xf32>
    %c1_51 = arith.constant 1 : index
    %c0_52 = arith.constant 0 : index
    %82 = vector.load %arg4[%c1_51, %c0_52] : memref<9x256xf32, #tpu.memory_space<vmem>>, vector<1x256xf32>
    %83 = vector.broadcast %82 : vector<1x256xf32> to vector<8x256xf32>
    %84 = arith.mulf %81, %83 : vector<8x256xf32>
    %c1_53 = arith.constant 1 : index
    %c8_54 = arith.constant 8 : index
    %c0_55 = arith.constant 0 : index
    %85 = vector.load %arg6[%c1_53, %c8_54, %c0_55] : memref<2x72x256xf32, #tpu.memory_space<vmem>>, vector<1x8x256xf32>
    %86 = vector.shape_cast %85 : vector<1x8x256xf32> to vector<8x256xf32>
    %87 = vector.shape_cast %84 : vector<8x256xf32> to vector<1x8x256xf32>
    tpu.vector_store %arg6[%c1_53, %c8_54, %c0_55], %87 {strides = array<i32>} : memref<2x72x256xf32, #tpu.memory_space<vmem>>, vector<1x8x256xf32>,
    %c15_i32_56 = arith.constant 15 : i32
    %88 = tpu.dynamic_rotate %73 by %c15_i32_56 dim 1 : vector<8x256xf32>, i32 -> vector<8x256xf32>
    %c2_57 = arith.constant 2 : index
    %c0_58 = arith.constant 0 : index
    %89 = vector.load %arg4[%c2_57, %c0_58] : memref<9x256xf32, #tpu.memory_space<vmem>>, vector<1x256xf32>
    %90 = vector.broadcast %89 : vector<1x256xf32> to vector<8x256xf32>
    %91 = arith.mulf %88, %90 : vector<8x256xf32>
    %c1_59 = arith.constant 1 : index
    %c16_60 = arith.constant 16 : index
    %c0_61 = arith.constant 0 : index
    %92 = vector.load %arg6[%c1_59, %c16_60, %c0_61] : memref<2x72x256xf32, #tpu.memory_space<vmem>>, vector<1x8x256xf32>
    %93 = vector.shape_cast %92 : vector<1x8x256xf32> to vector<8x256xf32>
    %94 = vector.shape_cast %91 : vector<8x256xf32> to vector<1x8x256xf32>
    tpu.vector_store %arg6[%c1_59, %c16_60, %c0_61], %94 {strides = array<i32>} : memref<2x72x256xf32, #tpu.memory_space<vmem>>, vector<1x8x256xf32>,
    %c1_i32_62 = arith.constant 1 : i32
    %95 = tpu.dynamic_rotate %73 by %c1_i32_62 dim 1 : vector<8x256xf32>, i32 -> vector<8x256xf32>
    %c3_63 = arith.constant 3 : index
    %c0_64 = arith.constant 0 : index
    %96 = vector.load %arg4[%c3_63, %c0_64] : memref<9x256xf32, #tpu.memory_space<vmem>>, vector<1x256xf32>
    %97 = vector.broadcast %96 : vector<1x256xf32> to vector<8x256xf32>
    %98 = arith.mulf %95, %97 : vector<8x256xf32>
    %c1_65 = arith.constant 1 : index
    %c24_66 = arith.constant 24 : index
    %c0_67 = arith.constant 0 : index
    %99 = vector.load %arg6[%c1_65, %c24_66, %c0_67] : memref<2x72x256xf32, #tpu.memory_space<vmem>>, vector<1x8x256xf32>
    %100 = vector.shape_cast %99 : vector<1x8x256xf32> to vector<8x256xf32>
    %101 = vector.shape_cast %98 : vector<8x256xf32> to vector<1x8x256xf32>
    tpu.vector_store %arg6[%c1_65, %c24_66, %c0_67], %101 {strides = array<i32>} : memref<2x72x256xf32, #tpu.memory_space<vmem>>, vector<1x8x256xf32>,
    %c1_68 = arith.constant 1 : index
    %c32_69 = arith.constant 32 : index
    %c0_70 = arith.constant 0 : index
    %102 = vector.load %arg6[%c1_68, %c32_69, %c0_70] : memref<2x72x256xf32, #tpu.memory_space<vmem>>, vector<1x8x256xf32>
    %103 = vector.shape_cast %102 : vector<1x8x256xf32> to vector<8x256xf32>
    %104 = vector.shape_cast %73 : vector<8x256xf32> to vector<1x8x256xf32>
    tpu.vector_store %arg6[%c1_68, %c32_69, %c0_70], %104 {strides = array<i32>} : memref<2x72x256xf32, #tpu.memory_space<vmem>>, vector<1x8x256xf32>,
    %c255_i32_71 = arith.constant 255 : i32
    %105 = tpu.dynamic_rotate %73 by %c255_i32_71 dim 1 : vector<8x256xf32>, i32 -> vector<8x256xf32>
    %c5_72 = arith.constant 5 : index
    %c0_73 = arith.constant 0 : index
    %106 = vector.load %arg4[%c5_72, %c0_73] : memref<9x256xf32, #tpu.memory_space<vmem>>, vector<1x256xf32>
    %107 = vector.broadcast %106 : vector<1x256xf32> to vector<8x256xf32>
    %108 = arith.mulf %105, %107 : vector<8x256xf32>
    %c1_74 = arith.constant 1 : index
    %c40_75 = arith.constant 40 : index
    %c0_76 = arith.constant 0 : index
    %109 = vector.load %arg6[%c1_74, %c40_75, %c0_76] : memref<2x72x256xf32, #tpu.memory_space<vmem>>, vector<1x8x256xf32>
    %110 = vector.shape_cast %109 : vector<1x8x256xf32> to vector<8x256xf32>
    %111 = vector.shape_cast %108 : vector<8x256xf32> to vector<1x8x256xf32>
    tpu.vector_store %arg6[%c1_74, %c40_75, %c0_76], %111 {strides = array<i32>} : memref<2x72x256xf32, #tpu.memory_space<vmem>>, vector<1x8x256xf32>,
    %c241_i32_77 = arith.constant 241 : i32
    %112 = tpu.dynamic_rotate %73 by %c241_i32_77 dim 1 : vector<8x256xf32>, i32 -> vector<8x256xf32>
    %c6_78 = arith.constant 6 : index
    %c0_79 = arith.constant 0 : index
    %113 = vector.load %arg4[%c6_78, %c0_79] : memref<9x256xf32, #tpu.memory_space<vmem>>, vector<1x256xf32>
    %114 = vector.broadcast %113 : vector<1x256xf32> to vector<8x256xf32>
    %115 = arith.mulf %112, %114 : vector<8x256xf32>
    %c1_80 = arith.constant 1 : index
    %c48_81 = arith.constant 48 : index
    %c0_82 = arith.constant 0 : index
    %116 = vector.load %arg6[%c1_80, %c48_81, %c0_82] : memref<2x72x256xf32, #tpu.memory_space<vmem>>, vector<1x8x256xf32>
    %117 = vector.shape_cast %116 : vector<1x8x256xf32> to vector<8x256xf32>
    %118 = vector.shape_cast %115 : vector<8x256xf32> to vector<1x8x256xf32>
    tpu.vector_store %arg6[%c1_80, %c48_81, %c0_82], %118 {strides = array<i32>} : memref<2x72x256xf32, #tpu.memory_space<vmem>>, vector<1x8x256xf32>,
    %c240_i32_83 = arith.constant 240 : i32
    %119 = tpu.dynamic_rotate %73 by %c240_i32_83 dim 1 : vector<8x256xf32>, i32 -> vector<8x256xf32>
    %c7_84 = arith.constant 7 : index
    %c0_85 = arith.constant 0 : index
    %120 = vector.load %arg4[%c7_84, %c0_85] : memref<9x256xf32, #tpu.memory_space<vmem>>, vector<1x256xf32>
    %121 = vector.broadcast %120 : vector<1x256xf32> to vector<8x256xf32>
    %122 = arith.mulf %119, %121 : vector<8x256xf32>
    %c1_86 = arith.constant 1 : index
    %c56_87 = arith.constant 56 : index
    %c0_88 = arith.constant 0 : index
    %123 = vector.load %arg6[%c1_86, %c56_87, %c0_88] : memref<2x72x256xf32, #tpu.memory_space<vmem>>, vector<1x8x256xf32>
    %124 = vector.shape_cast %123 : vector<1x8x256xf32> to vector<8x256xf32>
    %125 = vector.shape_cast %122 : vector<8x256xf32> to vector<1x8x256xf32>
    tpu.vector_store %arg6[%c1_86, %c56_87, %c0_88], %125 {strides = array<i32>} : memref<2x72x256xf32, #tpu.memory_space<vmem>>, vector<1x8x256xf32>,
    %c239_i32_89 = arith.constant 239 : i32
    %126 = tpu.dynamic_rotate %73 by %c239_i32_89 dim 1 : vector<8x256xf32>, i32 -> vector<8x256xf32>
    %c8_90 = arith.constant 8 : index
    %c0_91 = arith.constant 0 : index
    %127 = vector.load %arg4[%c8_90, %c0_91] : memref<9x256xf32, #tpu.memory_space<vmem>>, vector<1x256xf32>
    %128 = vector.broadcast %127 : vector<1x256xf32> to vector<8x256xf32>
    %129 = arith.mulf %126, %128 : vector<8x256xf32>
    %c1_92 = arith.constant 1 : index
    %c64_93 = arith.constant 64 : index
    %c0_94 = arith.constant 0 : index
    %130 = vector.load %arg6[%c1_92, %c64_93, %c0_94] : memref<2x72x256xf32, #tpu.memory_space<vmem>>, vector<1x8x256xf32>
    %131 = vector.shape_cast %130 : vector<1x8x256xf32> to vector<8x256xf32>
    %132 = vector.shape_cast %129 : vector<8x256xf32> to vector<1x8x256xf32>
    tpu.vector_store %arg6[%c1_92, %c64_93, %c0_94], %132 {strides = array<i32>} : memref<2x72x256xf32, #tpu.memory_space<vmem>>, vector<1x8x256xf32>,
    %c1_95 = arith.constant 1 : index
    %c0_96 = arith.constant 0 : index
    %c0_97 = arith.constant 0 : index
    %133 = vector.load %arg6[%c1_95, %c0_96, %c0_97] : memref<2x72x256xf32, #tpu.memory_space<vmem>>, vector<1x72x256xf32>
    %134 = vector.shape_cast %133 : vector<1x72x256xf32> to vector<72x256xf32>
    %cst_98 = arith.constant dense<0.000000e+00> : vector<8x256xf32>
    %135 = tpu.matmul %0, %134, %cst_98 {dimension_numbers = #tpu.dot_dimension_numbers<[1], [0], [0], [1], [0, 0, 1, 1], [], []>} : vector<8x72xf32>, vector<72x256xf32>, vector<8x256xf32> -> vector<8x256xf32>
    %136 = vector.broadcast %1 : vector<8x1xf32> to vector<8x256xf32>
    %137 = arith.addf %135, %136 : vector<8x256xf32>
    %138 = arith.addf %73, %137 : vector<8x256xf32>
    %c1_99 = arith.constant 1 : index
    %c0_100 = arith.constant 0 : index
    %c0_101 = arith.constant 0 : index
    %139 = vector.load %arg5[%c1_99, %c0_100, %c0_101] : memref<2x8x256xf32, #tpu.memory_space<vmem>>, vector<1x8x256xf32>
    %140 = vector.shape_cast %139 : vector<1x8x256xf32> to vector<8x256xf32>
    %141 = vector.shape_cast %138 : vector<8x256xf32> to vector<1x8x256xf32>
    tpu.vector_store %arg5[%c1_99, %c0_100, %c0_101], %141 {strides = array<i32>} : memref<2x8x256xf32, #tpu.memory_space<vmem>>, vector<1x8x256xf32>,
    return
  }
  func.func @transform_0(%arg0: i32) -> (i32, i32, i32) {
    %c0_i32 = arith.constant 0 : i32
    %c0_i32_0 = arith.constant 0 : i32
    %c0_i32_1 = arith.constant 0 : i32
    return %arg0, %c0_i32, %c0_i32_0 : i32, i32, i32
  }
  func.func @transform_1(%arg0: i32) -> (i32, i32) {
    %c0_i32 = arith.constant 0 : i32
    %c0_i32_0 = arith.constant 0 : i32
    %c0_i32_1 = arith.constant 0 : i32
    return %c0_i32, %c0_i32_0 : i32, i32
  }
  func.func @transform_2(%arg0: i32) -> (i32, i32) {
    %c0_i32 = arith.constant 0 : i32
    %c0_i32_0 = arith.constant 0 : i32
    %c0_i32_1 = arith.constant 0 : i32
    return %c0_i32, %c0_i32_0 : i32, i32
  }
  func.func @transform_3(%arg0: i32) -> (i32, i32) {
    %c0_i32 = arith.constant 0 : i32
    %c0_i32_0 = arith.constant 0 : i32
    %c0_i32_1 = arith.constant 0 : i32
    return %c0_i32, %c0_i32_0 : i32, i32
  }
  func.func @transform_4(%arg0: i32) -> (i32, i32, i32) {
    %c0_i32 = arith.constant 0 : i32
    %c0_i32_0 = arith.constant 0 : i32
    %c0_i32_1 = arith.constant 0 : i32
    return %arg0, %c0_i32, %c0_i32_0 : i32, i32, i32
  }
}

</mosaic_0001>

<bundles_post_ra>
// kernel: tpu_custom_call.1
= control target key start
LH: loop header
LB: loop body
LE: loop exit
PB: predicated region body
PF: predicated region fallthrough
CT: control target
= control target key end

     0   :  { %9 = vsyncpa [#allocation4], 0  ;;  %s1014_s0 = inlined_call_operand.hbm [shape: f32[2,8,256], index: 0, kind: input, shape index: {}]   ;;  %s1015_s1 = inlined_call_operand.vmem [shape: f32[8,72], index: 1, kind: input, shape index: {}]   ;;  %s1016_s2 = inlined_call_operand.vmem [shape: f32[8,1], index: 2, kind: input, shape index: {}]   ;;  %s1017_s3 = inlined_call_operand.hbm [shape: f32[9,256], index: 3, kind: input, shape index: {}]   ;;  %s1018_s4 = inlined_call_operand.hbm [shape: f32[2,8,256], index: 4, kind: output, shape index: {}]  }
   0x1   :  { %10 = vsyncpa [#allocation7], 0 }
   0x2   :  { %11 = vsyncpa [#allocation5], 0  ;;  %s762_s15 = smov [#allocation3]   ;;  %s690_s19 = scalar_lea.hbm %s1014_s0, 512 }
   0x3   :  { %s17_s16 = sshll.u32 %s762_s15, 4  ;;  %p691_p0 = scmp.ne.s32.totalorder %s1014_s0, %s690_s19  ;;  %s18_s16 = int_to_ptr.vmem [resolvable:$true] %s17_s16 }
   0x4   :  { %p694_p1 = scmp.lt.u32.totalorder %s690_s19, %s1014_s0 }
   0x6   :  { %p696_p2 = pnand %p694_p1, %p691_p0 }
   0x8   :  { %699 = shalt.err (!%p696_p2)
}
   0x9   :  { %s700_s24 = scalar_lea.vmem %s18_s16, 512  ;;  %p705_p4 = scmp.lt.s32.totalorder %s18_s16, %s18_s16 }
   0xa   :  { %p701_p3 = scmp.ne.s32.totalorder %s18_s16, %s700_s24  ;;  %p706_p5 = scmp.lt.s32.totalorder %s700_s24, %s700_s24 }
   0xc   :  { %p707_p6 = por %p706_p5, %p705_p4 }
   0xe   :  { %p708_p7 = pnand %p707_p6, %p701_p3 }
  0x10   :  { %711 = shalt.err (!%p708_p7)
}
  0x11   :  { %s763_s25 = smov 256   ;;  %s764_s26 = smov 16  }
  0x12   :  { %23 = dma.hbm_to_vmem [thread:$0]  %s1014_s0, 512, %s18_s16, [#allocation4], %s763_s25, %s763_s25, %s764_s26  }
  0x13   :  { %s765_s29 = smov [#allocation6]   ;;  %s712_s7 = scalar_lea.hbm %s1017_s3, 512 }
  0x14   :  { %s33_s30 = sshll.u32 %s765_s29, 4  ;;  %p713_p8 = scmp.ne.s32.totalorder %s1017_s3, %s712_s7  ;;  %s34_s30 = int_to_ptr.vmem [resolvable:$true] %s33_s30 }
  0x15   :  { %p716_p9 = scmp.lt.u32.totalorder %s712_s7, %s1017_s3 }
  0x17   :  { %p718_p10 = pnand %p716_p9, %p713_p8 }
  0x19   :  { %721 = shalt.err (!%p718_p10)
}
  0x1a   :  { %s722_s12 = scalar_lea.vmem %s34_s30, 512  ;;  %p727_p12 = scmp.lt.s32.totalorder %s34_s30, %s34_s30 }
  0x1b   :  { %p723_p11 = scmp.ne.s32.totalorder %s34_s30, %s722_s12  ;;  %p728_p13 = scmp.lt.s32.totalorder %s722_s12, %s722_s12 }
  0x1d   :  { %p729_p0 = por %p728_p13, %p727_p12 }
  0x1f   :  { %p730_p1 = pnand %p729_p0, %p723_p11 }
  0x21   :  { %733 = shalt.err (!%p730_p1)
}
  0x22   :  { %39 = dma.hbm_to_vmem [thread:$0]  %s1017_s3, 512, %s34_s30, [#allocation7], %s763_s25, %s763_s25, %s764_s26  }
  0x23   :  { %756 = dma.done.wait [#allocation4], 512  }
  0x24   :  { %757 = vsyncadd [#allocation4], 4294966784 }
  0x25   :  { %758 = dma.done.wait [#allocation7], 512  }
  0x26   :  { %759 = vsyncadd [#allocation7], 4294966784  ;;  %v831_v0 = vld [vmem:[#allocation3] sm:$0xff]  ;;  %s766_s14 = smov 17   ;;  %v836_v1 = vld [vmem:[#allocation3 + $0x8] sm:$0xff]  ;;  %s767_s3 = smov 15   ;;  %v54_v7 = vlaneseq }
  0x27   :  { %75 = vrot.lane.b32.xlu1 %v831_v0, %s764_s26  ;;  %50 = vrot.lane.b32.xlu0 %v831_v0, %s766_s14  ;;  %v841_v2 = vld [vmem:[#allocation3 + $0x18] sm:$0xff]  ;;  %v843_v3 = vld [vmem:[#allocation3 + $0x10] sm:$0xff]  ;;  %s768_s15 = smov 1   ;;  %s769_s16 = smov 127   ;;  %v772_v4 = vmov 0.0   ;;  %v773_v5 = vmov 0  }
  0x28   :  { %s770_s17 = smov 113   ;;  %s771_s18 = smov 112   ;;  %336 = vmatprep.mubr.f32.mxu0 %v772_v4  ;;  %611 = vmatprep.mubr.f32.mxu1 %v772_v4  ;;  %v47_v6 = vld [vmem:[%s1016_s2] sm:$0xff]  ;;  %v62_v8 = vshrl.u32 %v54_v7, 7  ;;  %v878_v9 = vand.u32 127, %v54_v7  ;;  %vm268_vm8 = vcmask 588800  }
  0x29   :  { %689 = vset.pattern.permute.xlu0 %v773_v5  ;;  %s774_s19 = smov 111   ;;  %v83_v12 = vld [vmem:[#allocation6 + $0x1] ss:$8 sm:$0x3] }
  0x2a   :  { %v880_v10 = vsub.s32 0, %v62_v8  ;;  %v882_v11 = vsub.s32 1, %v62_v8  ;;  %v59_v13 = vld [vmem:[#allocation6] ss:$8 sm:$0x3]  ;;  %vm79_vm0 = vcmp.lt.s32.totalorder %v878_v9, 16 }
  0x2b   :  { %77 = vrot.lane.b32.xlu1 %v836_v1, %s764_s26  ;;  %52 = vrot.lane.b32.xlu0 %v836_v1, %s766_s14  ;;  %vm56_vm1 = vcmp.lt.s32.totalorder %v878_v9, 17  ;;  %v356_v30 = vld [vmem:[#allocation6] ss:$8 sm:$0x3]  ;;  %vm103_vm2 = vcmp.lt.s32.totalorder %v878_v9, 15  ;;  %vm127_vm3 = vcmp.lt.s32.totalorder %v878_v9, 1 }
  0x2c   :  { %v88_v16 = vrot.slane %v83_v12, %v880_v10  ;;  %v64_v17 = vrot.slane %v59_v13, %v880_v10  ;;  %v68_v18 = vrot.slane %v59_v13, %v882_v11  ;;  %v92_v19 = vrot.slane %v83_v12, %v882_v11  ;;  %v379_v31 = vld [vmem:[#allocation6 + $0x1] ss:$8 sm:$0x3]  ;;  %v107_v48 = vld [vmem:[#allocation6 + $0x2] ss:$8 sm:$0x3] }
  0x2d   :  { %v361_v36 = vrot.slane %v356_v30, %v880_v10  ;;  %v384_v37 = vrot.slane %v379_v31, %v880_v10  ;;  %v365_v38 = vrot.slane %v356_v30, %v882_v11  ;;  %v388_v39 = vrot.slane %v379_v31, %v882_v11  ;;  %v131_v51 = vld [vmem:[#allocation6 + $0x3] ss:$8 sm:$0x3]  ;;  %v401_v13 = vld [vmem:[#allocation6 + $0x2] ss:$8 sm:$0x3] }
  0x2e   :  { %v112_v56 = vrot.slane %v107_v48, %v880_v10  ;;  %v116_v57 = vrot.slane %v107_v48, %v882_v11  ;;  %v136_v58 = vrot.slane %v131_v51, %v880_v10  ;;  %v140_v59 = vrot.slane %v131_v51, %v882_v11 }
  0x2f   :  { %352 = vrot.lane.b32.xlu1 %v841_v2, %s766_s14  ;;  %350 = vrot.lane.b32.xlu0 %v843_v3, %s766_s14  ;;  %vm153_vm4 = vcmp.lt.s32.totalorder %v878_v9, 127  ;;  %vm177_vm5 = vcmp.lt.s32.totalorder %v878_v9, 113  ;;  %vm201_vm6 = vcmp.lt.s32.totalorder %v878_v9, 112  ;;  %vm225_vm7 = vcmp.lt.s32.totalorder %v878_v9, 111 }
  0x33   :  { %375 = vrot.lane.b32.xlu1 %v841_v2, %s764_s26  ;;  %373 = vrot.lane.b32.xlu0 %v843_v3, %s764_s26 }
  0x37   :  { %101 = vrot.lane.b32.xlu1 %v836_v1, %s767_s3  ;;  %99 = vrot.lane.b32.xlu0 %v831_v0, %s767_s3 }
  0x3b   :  { %125 = vrot.lane.b32.xlu1 %v836_v1, %s768_s15  ;;  %123 = vrot.lane.b32.xlu0 %v831_v0, %s768_s15 }
  0x3f   :  { %397 = vrot.lane.b32.xlu1 %v841_v2, %s767_s3  ;;  %395 = vrot.lane.b32.xlu0 %v843_v3, %s767_s3 }
  0x43   :  { %419 = vrot.lane.b32.xlu1 %v841_v2, %s768_s15  ;;  %417 = vrot.lane.b32.xlu0 %v843_v3, %s768_s15 }
  0x47   :  { %151 = vrot.lane.b32.xlu1 %v836_v1, %s769_s16  ;;  %149 = vrot.lane.b32.xlu0 %v831_v0, %s769_s16 }
  0x4b   :  { %443 = vrot.lane.b32.xlu1 %v841_v2, %s769_s16  ;;  %441 = vrot.lane.b32.xlu0 %v843_v3, %s769_s16 }
  0x4f   :  { %175 = vrot.lane.b32.xlu1 %v836_v1, %s770_s17  ;;  %173 = vrot.lane.b32.xlu0 %v831_v0, %s770_s17 }
  0x53   :  { %199 = vrot.lane.b32.xlu1 %v836_v1, %s771_s18  ;;  %197 = vrot.lane.b32.xlu0 %v831_v0, %s771_s18 }
  0x57   :  { %465 = vrot.lane.b32.xlu1 %v841_v2, %s770_s17  ;;  %463 = vrot.lane.b32.xlu0 %v843_v3, %s770_s17 }
  0x5b   :  { %487 = vrot.lane.b32.xlu1 %v841_v2, %s771_s18  ;;  %485 = vrot.lane.b32.xlu0 %v843_v3, %s771_s18 }
  0x5f   :  { %223 = vrot.lane.b32.xlu1 %v836_v1, %s774_s19  ;;  %221 = vrot.lane.b32.xlu0 %v831_v0, %s774_s19 }
  0x63   :  { %509 = vrot.lane.b32.xlu1 %v841_v2, %s774_s19  ;;  %507 = vrot.lane.b32.xlu0 %v843_v3, %s774_s19 }
  0x67   :  { %265 = vperm.xlu0 %689, %v47_v6  }
  0x99   :  { %v76_v14 = vpop.permute.xlu1 %75  ;;  %v51_v15 = vpop.permute.xlu0 %50 }
  0x9d   :  { %v78_v20 = vpop.permute.xlu1 %77  ;;  %v53_v21 = vpop.permute.xlu0 %52 }
  0x9e   :  { %v80_v22 = vsel %vm79_vm0, %v76_v14, %v78_v20  ;;  %v81_v23 = vsel %vm79_vm0, %v78_v20, %v76_v14  ;;  %v57_v24 = vsel %vm56_vm1, %v51_v15, %v53_v21  ;;  %v58_v25 = vsel %vm56_vm1, %v53_v21, %v51_v15  ;;  %v423_v14 = vld [vmem:[#allocation6 + $0x3] ss:$8 sm:$0x3] }
  0x9f   :  { %v95_v26 = vmul.f32 %v88_v16, %v81_v23  ;;  %v71_v27 = vmul.f32 %v64_v17, %v58_v25  ;;  %v72_v28 = vmul.f32 %v68_v18, %v57_v24  ;;  %v96_v29 = vmul.f32 %v92_v19, %v80_v22  ;;  %v157_v23 = vld [vmem:[#allocation6 + $0x5] ss:$8 sm:$0x3] }
  0xa0   :  { %v406_v19 = vrot.slane %v401_v13, %v880_v10  ;;  %v410_v20 = vrot.slane %v401_v13, %v882_v11  ;;  %v428_v21 = vrot.slane %v423_v14, %v880_v10  ;;  %v432_v22 = vrot.slane %v423_v14, %v882_v11 }
  0xa1   :  { %v353_v32 = vpop.permute.xlu1 %352  ;;  %v351_v33 = vpop.permute.xlu0 %350  ;;  %v643_v34 = vpack.c.bf16 %v96_v29, %v72_v28  ;;  %v645_v35 = vpack.c.bf16 %v95_v26, %v71_v27  ;;  %v162_v30 = vrot.slane %v157_v23, %v880_v10  ;;  %v166_v31 = vrot.slane %v157_v23, %v882_v11 }
  0xa2   :  { %v354_v40 = vsel %vm56_vm1, %v351_v33, %v353_v32  ;;  %v355_v41 = vsel %vm56_vm1, %v353_v32, %v351_v33 }
  0xa3   :  { %644 = vmatprep.subr.bf16.mxu0 %v643_v34  ;;  %v368_v46 = vmul.f32 %v361_v36, %v355_v41  ;;  %v369_v49 = vmul.f32 %v365_v38, %v354_v40  ;;  %v447_v36 = vld [vmem:[#allocation6 + $0x5] ss:$8 sm:$0x3] }
  0xa4   :  { %646 = vmatpush1.bf16.msra.mxu0 %v645_v35 }
  0xa5   :  { %v376_v42 = vpop.permute.xlu1 %375  ;;  %v374_v43 = vpop.permute.xlu0 %373 }
  0xa6   :  { %v377_v44 = vsel %vm79_vm0, %v374_v43, %v376_v42  ;;  %v378_v45 = vsel %vm79_vm0, %v376_v42, %v374_v43 }
  0xa7   :  { %v391_v47 = vmul.f32 %v384_v37, %v378_v45  ;;  %v392_v50 = vmul.f32 %v388_v39, %v377_v44  ;;  %v452_v45 = vrot.slane %v447_v36, %v880_v10 }
  0xa9   :  { %v102_v52 = vpop.permute.xlu1 %101  ;;  %v100_v53 = vpop.permute.xlu0 %99  ;;  %v659_v54 = vpack.c.bf16 %v392_v50, %v369_v49  ;;  %v661_v55 = vpack.c.bf16 %v391_v47, %v368_v46  ;;  %v456_v46 = vrot.slane %v447_v36, %v882_v11 }
  0xaa   :  { %v104_v60 = vsel %vm103_vm2, %v100_v53, %v102_v52  ;;  %v105_v61 = vsel %vm103_vm2, %v102_v52, %v100_v53 }
  0xab   :  { %660 = vmatprep.subr.bf16.mxu1 %v659_v54  ;;  %v119_v6 = vmul.f32 %v112_v56, %v105_v61  ;;  %v120_v7 = vmul.f32 %v116_v57, %v104_v60  ;;  %v205_v56 = vld [vmem:[#allocation6 + $0x7] ss:$8 sm:$0x3] }
  0xac   :  { %662 = vmatpush1.bf16.msra.mxu1 %v661_v55  ;;  %v181_v55 = vld [vmem:[#allocation6 + $0x6] ss:$8 sm:$0x3] }
  0xad   :  { %v126_v62 = vpop.permute.xlu1 %125  ;;  %v124_v63 = vpop.permute.xlu0 %123  ;;  %v186_v61 = vrot.slane %v181_v55, %v880_v10 }
  0xae   :  { %v128_v4 = vsel %vm127_vm3, %v124_v63, %v126_v62  ;;  %v129_v5 = vsel %vm127_vm3, %v126_v62, %v124_v63  ;;  %v190_v62 = vrot.slane %v181_v55, %v882_v11  ;;  %v210_v63 = vrot.slane %v205_v56, %v880_v10 }
  0xaf   :  { %v143_v8 = vmul.f32 %v136_v58, %v129_v5  ;;  %v144_v12 = vmul.f32 %v140_v59, %v128_v4  ;;  %v214_v4 = vrot.slane %v205_v56, %v882_v11 }
  0xb1   :  { %v398_v15 = vpop.permute.xlu1 %397  ;;  %v396_v16 = vpop.permute.xlu0 %395  ;;  %v647_v17 = vpack.c.bf16 %v144_v12, %v120_v7  ;;  %v649_v18 = vpack.c.bf16 %v143_v8, %v119_v6 }
  0xb2   :  { %v399_v24 = vsel %vm103_vm2, %v396_v16, %v398_v15  ;;  %v400_v25 = vsel %vm103_vm2, %v398_v15, %v396_v16 }
  0xb3   :  { %648 = vmatprep.subr.bf16.mxu0 %v647_v17  ;;  %v413_v32 = vmul.f32 %v406_v19, %v400_v25  ;;  %v414_v33 = vmul.f32 %v410_v20, %v399_v24  ;;  %v491_v19 = vld [vmem:[#allocation6 + $0x7] ss:$8 sm:$0x3] }
  0xb4   :  { %650 = vmatpush1.bf16.msra.mxu0 %v649_v18  ;;  %v469_v18 = vld [vmem:[#allocation6 + $0x6] ss:$8 sm:$0x3] }
  0xb5   :  { %v420_v26 = vpop.permute.xlu1 %419  ;;  %v418_v27 = vpop.permute.xlu0 %417  ;;  %v474_v24 = vrot.slane %v469_v18, %v880_v10  ;;  %v478_v25 = vrot.slane %v469_v18, %v882_v11 }
  0xb6   :  { %v421_v28 = vsel %vm127_vm3, %v418_v27, %v420_v26  ;;  %v422_v29 = vsel %vm127_vm3, %v420_v26, %v418_v27  ;;  %v496_v26 = vrot.slane %v491_v19, %v880_v10  ;;  %v500_v27 = vrot.slane %v491_v19, %v882_v11 }
  0xb7   :  { %v435_v34 = vmul.f32 %v428_v21, %v422_v29  ;;  %v436_v35 = vmul.f32 %v432_v22, %v421_v28  ;;  %v229_v28 = vld [vmem:[#allocation6 + $0x10] ss:$8 sm:$0x3] }
  0xb8   :  { %v238_v36 = vrot.slane %v229_v28, %v882_v11 }
  0xb9   :  { %v152_v37 = vpop.permute.xlu1 %151  ;;  %v150_v38 = vpop.permute.xlu0 %149  ;;  %v663_v39 = vpack.c.bf16 %v436_v35, %v414_v33  ;;  %v665_v40 = vpack.c.bf16 %v435_v34, %v413_v32  ;;  %v234_v35 = vrot.slane %v229_v28, %v880_v10 }
  0xba   :  { %v154_v41 = vsel %vm153_vm4, %v150_v38, %v152_v37  ;;  %v155_v42 = vsel %vm153_vm4, %v152_v37, %v150_v38 }
  0xbb   :  { %v169_v43 = vmul.f32 %v162_v30, %v154_v41  ;;  %v170_v44 = vmul.f32 %v166_v31, %v155_v42  ;;  %664 = vmatprep.subr.bf16.mxu1 %v663_v39  ;;  %v513_v41 = vld [vmem:[#allocation6 + $0x10] ss:$8 sm:$0x3] }
  0xbc   :  { %666 = vmatpush1.bf16.msra.mxu1 %v665_v40 }
  0xbd   :  { %v444_v47 = vpop.permute.xlu1 %443  ;;  %v442_v48 = vpop.permute.xlu0 %441  ;;  %v651_v49 = vpack.c.bf16 %v170_v44, %v836_v1  ;;  %v653_v50 = vpack.c.bf16 %v169_v43, %v831_v0 }
  0xbe   :  { %v445_v51 = vsel %vm153_vm4, %v442_v48, %v444_v47  ;;  %v446_v52 = vsel %vm153_vm4, %v444_v47, %v442_v48 }
  0xbf   :  { %v459_v53 = vmul.f32 %v452_v45, %v445_v51  ;;  %v460_v54 = vmul.f32 %v456_v46, %v446_v52  ;;  %652 = vmatprep.subr.bf16.mxu0 %v651_v49  ;;  %v522_v51 = vrot.slane %v513_v41, %v882_v11  ;;  %v46_v52 = vld [vmem:[%s1015_s1] sm:$0xff]  ;;  %s775_s1 = smov [#allocation8]  }
  0xc0   :  { %654 = vmatpush1.bf16.msra.mxu0 %v653_v50  ;;  %v518_v50 = vrot.slane %v513_v41, %v880_v10  ;;  %s628_s23 = sshll.u32 %s775_s1, 4  ;;  %s629_s23 = int_to_ptr.vmem [resolvable:$true] %s628_s23 }
  0xc1   :  { %v176_v57 = vpop.permute.xlu1 %175  ;;  %v174_v58 = vpop.permute.xlu0 %173  ;;  %v667_v59 = vpack.c.bf16 %v460_v54, %v841_v2  ;;  %v669_v60 = vpack.c.bf16 %v459_v53, %v843_v3  ;;  %s734_s24 = scalar_lea.vmem %s629_s23, 512  ;;  %p739_p3 = scmp.lt.s32.totalorder %s629_s23, %s629_s23 }
  0xc2   :  { %v178_v5 = vsel %vm177_vm5, %v174_v58, %v176_v57  ;;  %v179_v6 = vsel %vm177_vm5, %v176_v57, %v174_v58  ;;  %p735_p2 = scmp.ne.s32.totalorder %s629_s23, %s734_s24  ;;  %p740_p4 = scmp.lt.s32.totalorder %s734_s24, %s734_s24 }
  0xc3   :  { %668 = vmatprep.subr.bf16.mxu1 %v667_v59  ;;  %v193_v14 = vmul.f32 %v186_v61, %v178_v5  ;;  %v194_v15 = vmul.f32 %v190_v62, %v179_v6 }
  0xc4   :  { %670 = vmatpush1.bf16.msra.mxu1 %v669_v60  ;;  %p741_p5 = por %p740_p4, %p739_p3 }
  0xc5   :  { %v200_v7 = vpop.permute.xlu1 %199  ;;  %v198_v8 = vpop.permute.xlu0 %197 }
  0xc6   :  { %v202_v12 = vsel %vm201_vm6, %v198_v8, %v200_v7  ;;  %v203_v13 = vsel %vm201_vm6, %v200_v7, %v198_v8  ;;  %p742_p6 = pnand %p741_p5, %p735_p2 }
  0xc7   :  { %v217_v16 = vmul.f32 %v210_v63, %v202_v12  ;;  %v218_v17 = vmul.f32 %v214_v4, %v203_v13 }
  0xc9   :  { %v466_v20 = vpop.permute.xlu1 %465  ;;  %v464_v21 = vpop.permute.xlu0 %463  ;;  %v655_v22 = vpack.c.bf16 %v218_v17, %v194_v15  ;;  %v657_v23 = vpack.c.bf16 %v217_v16, %v193_v14 }
  0xca   :  { %v467_v29 = vsel %vm177_vm5, %v464_v21, %v466_v20  ;;  %v468_v30 = vsel %vm177_vm5, %v466_v20, %v464_v21 }
  0xcb   :  { %656 = vmatprep.subr.bf16.mxu0 %v655_v22  ;;  %v481_v37 = vmul.f32 %v474_v24, %v467_v29  ;;  %v482_v38 = vmul.f32 %v478_v25, %v468_v30 }
  0xcc   :  { %658 = vmatpush1.bf16.msra.mxu0 %v657_v23 }
  0xcd   :  { %v488_v31 = vpop.permute.xlu1 %487  ;;  %v486_v32 = vpop.permute.xlu0 %485 }
  0xce   :  { %v489_v33 = vsel %vm201_vm6, %v486_v32, %v488_v31  ;;  %v490_v34 = vsel %vm201_vm6, %v488_v31, %v486_v32 }
  0xcf   :  { %v503_v39 = vmul.f32 %v496_v26, %v489_v33  ;;  %v504_v40 = vmul.f32 %v500_v27, %v490_v34 }
  0xd1   :  { %v224_v42 = vpop.permute.xlu1 %223  ;;  %v222_v43 = vpop.permute.xlu0 %221  ;;  %v671_v44 = vpack.c.bf16 %v504_v40, %v482_v38  ;;  %v673_v45 = vpack.c.bf16 %v503_v39, %v481_v37 }
  0xd2   :  { %v226_v46 = vsel %vm225_vm7, %v222_v43, %v224_v42  ;;  %v227_v47 = vsel %vm225_vm7, %v224_v42, %v222_v43 }
  0xd3   :  { %v241_v48 = vmul.f32 %v234_v35, %v226_v46  ;;  %v242_v49 = vmul.f32 %v238_v36, %v227_v47  ;;  %672 = vmatprep.subr.bf16.mxu1 %v671_v44 }
  0xd4   :  { %674 = vmatpush1.bf16.msra.mxu1 %v673_v45 }
  0xd5   :  { %v510_v53 = vpop.permute.xlu1 %509  ;;  %288 = vmatprep.subr.mxu0 %v242_v49  ;;  %v508_v54 = vpop.permute.xlu0 %507 }
  0xd6   :  { %v511_v55 = vsel %vm225_vm7, %v508_v54, %v510_v53  ;;  %v512_v56 = vsel %vm225_vm7, %v510_v53, %v508_v54  ;;  %289 = vmatpush1.msra.mxu0 %v241_v48 }
  0xd7   :  { %v525_v57 = vmul.f32 %v518_v50, %v511_v55  ;;  %v526_v10 = vmul.f32 %v522_v51, %v512_v56  ;;  %641 = vmatmul.mubr.msk.f32.vlgmr.msra.gmra.mrb[0].mxu0 %vm268_vm8, %v46_v52 }
  0xd9   :  { %563 = vmatprep.subr.mxu1 %v526_v10 }
  0xda   :  { %564 = vmatpush1.msra.mxu1 %v525_v57 }
  0xdb   :  { %642 = vmatmul.mubr.msk.f32.vlgmr.msra.gmra.mrb[0].mxu1 %vm268_vm8, %v46_v52 }
  0xe6   :  { %v266_v11 = vpop.permute.xlu0 %265 }
 0x1aa   :  { %v338_v58 = vpop.f32.mrb[0].mxu0 }
 0x1ab   :  { %v339_v59 = vadd.f32 %v338_v58, %v266_v11  ;;  %v340_v60 = vpop.f32.mrb[1].mxu0 }
 0x1ac   :  { %v341_v61 = vadd.f32 %v340_v60, %v266_v11 }
 0x1ad   :  { %v343_v62 = vadd.f32 %v339_v59, %v831_v0 }
 0x1ae   :  { %v344_v63 = vadd.f32 %v341_v61, %v836_v1  ;;  %v613_v4 = vpop.f32.mrb[0].mxu1 }
 0x1af   :  { %345 = vst [vmem:[#allocation8] sm:$0xff] %v343_v62  ;;  %v614_v9 = vadd.f32 %v613_v4, %v266_v11  ;;  %v615_v5 = vpop.f32.mrb[1].mxu1 }
 0x1b0   :  { %346 = vst [vmem:[#allocation8 + $0x8] sm:$0xff] %v344_v63  ;;  %v616_v6 = vadd.f32 %v615_v5, %v266_v11 }
 0x1b1   :  { %v618_v7 = vadd.f32 %v614_v9, %v843_v3 }
 0x1b2   :  { %v619_v8 = vadd.f32 %v616_v6, %v841_v2 }
 0x1b3   :  { %621 = vst [vmem:[#allocation8 + $0x10] sm:$0xff] %v618_v7 }
 0x1b4   :  { %622 = vst [vmem:[#allocation8 + $0x18] sm:$0xff] %v619_v8 }
 0x1b5   :  { %745 = shalt.err (!%p742_p6)
}
 0x1b6   :  { %s746_s29 = scalar_lea.hbm %s1018_s4, 512 }
 0x1b7   :  { %p747_p7 = scmp.ne.s32.totalorder %s1018_s4, %s746_s29  ;;  %p750_p8 = scmp.lt.u32.totalorder %s746_s29, %s1018_s4 }
 0x1b9   :  { %p752_p9 = pnand %p750_p8, %p747_p7 }
 0x1bb   :  { %755 = shalt.err (!%p752_p9)
}
 0x1bc   :  { %634 = dma.vmem_to_hbm [thread:$0]  %s629_s23, 512, %s1018_s4, [#allocation5], %s763_s25, %s763_s25, %s764_s26  }
 0x1bd   :  { %760 = dma.done.wait [#allocation5], 512  }
 0x1be   :  { %761 = vsyncadd [#allocation5], 4294966784 }
 0x1bf   :  { %638 = vsyncpa [#allocation4], 1 }
 0x1c0   :  { %639 = vsyncpa [#allocation7], 1 }
 0x1c1   :  { %640 = vsyncpa [#allocation5], 1 }

</bundles_post_ra>
